<compile_context>
chip_gen: v7x
topology: tpu7x:2x2x1
jax: 0.10.0
libtpu: 0.0.40
codegen_flags: <defaults>
</compile_context>

<pallas_src>
import functools
import math

import jax
import jax.numpy as jnp
from jax.experimental import pallas as pl
from jax.experimental.pallas import tpu as pltpu


def _round_up(x: int, m: int) -> int:
    return ((x + m - 1) // m) * m


# ----------------------------------------------------------------------------------
# Kernels
# ----------------------------------------------------------------------------------
def _fused_head_kernel(x_ref, w_ref, b_ref, out_ref):
    # x tile arrives in its native dtype; cast to bf16 on the VPU, one MXU pass,
    # f32 accumulation + f32 bias add, then cast to the output dtype.
    x = x_ref[...].astype(jnp.bfloat16)
    acc = jnp.dot(x, w_ref[...], preferred_element_type=jnp.float32)
    out_ref[...] = (acc + b_ref[...]).astype(out_ref.dtype)


def _fused_head_kernel_ctiled(x_ref, w_ref, b_ref, out_ref, acc_ref, *, c_total, block_c):
    # C-tiled variant: grid = (n_blocks, c_blocks), C axis last / "arbitrary".
    kc = pl.program_id(1)

    @pl.when(kc == 0)
    def _():
        acc_ref[...] = jnp.zeros_like(acc_ref)

    x = x_ref[...]
    # The last C block may read past the true C (unspecified data); mask it so
    # garbage (possibly NaN) never reaches the accumulator.  W's padded rows are 0.
    col = kc * block_c + jax.lax.broadcasted_iota(jnp.int32, x.shape, 1)
    x = jnp.where(col < c_total, x, 0).astype(jnp.bfloat16)
    acc_ref[...] += jnp.dot(x, w_ref[...], preferred_element_type=jnp.float32)

    @pl.when(kc == pl.num_programs(1) - 1)
    def _():
        out_ref[...] = (acc_ref[...] + b_ref[...]).astype(out_ref.dtype)


# ----------------------------------------------------------------------------------
# Wrapper
# ----------------------------------------------------------------------------------
_VMEM_BUDGET = 32 * 1024 * 1024  # conservative (~half of v7x's 64 MiB physical VMEM)


def _choose_tm(n: int, block_n: int) -> int:
    """Row tile: big (HBM roofline), 128-aligned when possible (MXU rows, v5e),
    and producing >= 2 grid steps for small N so both v7x TensorCores get work."""
    if n < 16:
        return max(n, 1)                      # block dim == full dim (always legal)
    if n <= 2 * block_n:
        tm = -(-n // 2)                       # at least two grid steps
    else:
        tm = block_n
    if tm >= 128:
        tm = (tm // 128) * 128
    else:
        tm = _round_up(tm, 8)
    return tm


@functools.partial(jax.jit, static_argnames=("block_n", "block_c", "out_dtype"))
def fast_rcnn_predictor(x, w_cls, b_cls, w_bbox, b_bbox, *,
                        block_n: int = 512, block_c=None, out_dtype=None):
    """Forward pass of FastRCNNPredictor.

    x:       (N, C) or (N, C, 1, 1)
    w_cls:   (C, num_classes)         (transposed vs torch Linear.weight)
    b_cls:   (num_classes,)
    w_bbox:  (C, num_classes * 4)
    b_bbox:  (num_classes * 4,)
    returns: (scores (N, num_classes), bbox_deltas (N, num_classes*4))
    """
    if x.ndim == 4:
        assert x.shape[2:] == (1, 1), (
            f"x has the wrong shape, expecting the last two dimensions to be [1,1] "
            f"instead of {list(x.shape[2:])}"
        )
    x2 = x.reshape(x.shape[0], -1)            # flatten(start_dim=1)

    n, c = x2.shape
    nc = w_cls.shape[1]
    nb = w_bbox.shape[1]
    out_dt = x2.dtype if out_dtype is None else jnp.dtype(out_dtype)

    # Lane-aligned per-head widths: both output slices start on a 128 boundary.
    nc_pad = _round_up(nc, 128)
    nb_pad = _round_up(nb, 128)
    k_pad = nc_pad + nb_pad

    tm = _choose_tm(n, block_n)
    n_blocks = -(-n // tm)

    x_bytes = x2.dtype.itemsize
    o_bytes = out_dt.itemsize

    # VMEM accounting (double-buffered pipelined operands).
    simple_vmem = (2 * tm * c * x_bytes       # x tiles
                   + 2 * c * k_pad * 2        # fused W (constant index_map, 2 bufs)
                   + 2 * k_pad * 4            # bias
                   + 2 * tm * k_pad * o_bytes)  # out tiles
    use_ctiled = (block_c is not None) or (simple_vmem > _VMEM_BUDGET)

    if use_ctiled:
        if block_c is None:
            fixed = 2 * k_pad * 4 + 2 * tm * k_pad * o_bytes + tm * k_pad * 4
            per_c = 2 * tm * x_bytes + 2 * k_pad * 2
            bc = max((_VMEM_BUDGET - fixed) // max(per_c, 1), 128)
            block_c = max((bc // 128) * 128, 128)
        block_c = min(block_c, _round_up(c, 128))
        c_pad = _round_up(c, block_c)
        c_blocks = c_pad // block_c
    else:
        c_pad = c

    # Host-side weight/bias packing (weights only -- x stays untouched in HBM).
    w = jnp.concatenate(
        [jnp.pad(w_cls, ((0, c_pad - c), (0, nc_pad - nc))),
         jnp.pad(w_bbox, ((0, c_pad - c), (0, nb_pad - nb)))],
        axis=1,
    ).astype(jnp.bfloat16)                    # (c_pad, k_pad)
    b = jnp.concatenate(
        [jnp.pad(b_cls, (0, nc_pad - nc)), jnp.pad(b_bbox, (0, nb_pad - nb))]
    ).reshape(1, k_pad).astype(jnp.float32)   # (1, k_pad)

    cost = pl.CostEstimate(
        flops=2 * n * c_pad * k_pad,
        transcendentals=0,
        bytes_accessed=(n * c * x_bytes + c_pad * k_pad * 2 + k_pad * 4
                        + n * k_pad * o_bytes),
    )

    if not use_ctiled:
        vmem_est = simple_vmem
        vmem_limit = int(min(64 * 2**20, max(32 * 2**20, vmem_est * 3 // 2)))
        out = pl.pallas_call(
            _fused_head_kernel,
            out_shape=jax.ShapeDtypeStruct((n, k_pad), out_dt),
            grid_spec=pltpu.PrefetchScalarGridSpec(
                num_scalar_prefetch=0,
                grid=(n_blocks,),
                in_specs=[
                    pl.BlockSpec((tm, c), lambda i: (i, 0)),        # x tile (pipelined)
                    pl.BlockSpec((c, k_pad), lambda i: (0, 0)),     # fused W (resident)
                    pl.BlockSpec((1, k_pad), lambda i: (0, 0)),     # fused bias (resident)
                ],
                out_specs=pl.BlockSpec((tm, k_pad), lambda i: (i, 0)),
            ),
            compiler_params=pltpu.CompilerParams(
                dimension_semantics=("parallel",),
                vmem_limit_bytes=vmem_limit,
            ),
            cost_estimate=cost,
        )(x2, w, b)
    else:
        vmem_est = (2 * tm * block_c * x_bytes + 2 * block_c * k_pad * 2
                    + 2 * k_pad * 4 + 2 * tm * k_pad * o_bytes + tm * k_pad * 4)
        vmem_limit = int(min(64 * 2**20, max(32 * 2**20, vmem_est * 3 // 2)))
        kern = functools.partial(_fused_head_kernel_ctiled, c_total=c, block_c=block_c)
        out = pl.pallas_call(
            kern,
            out_shape=jax.ShapeDtypeStruct((n, k_pad), out_dt),
            grid_spec=pltpu.PrefetchScalarGridSpec(
                num_scalar_prefetch=0,
                grid=(n_blocks, c_blocks),
                in_specs=[
                    pl.BlockSpec((tm, block_c), lambda i, k: (i, k)),      # x tile
                    pl.BlockSpec((block_c, k_pad), lambda i, k: (k, 0)),   # W C-slab
                    pl.BlockSpec((1, k_pad), lambda i, k: (0, 0)),         # bias
                ],
                out_specs=pl.BlockSpec((tm, k_pad), lambda i, k: (i, 0)),
                scratch_shapes=[pltpu.VMEM((tm, k_pad), jnp.float32)],     # f32 accumulator
            ),
            compiler_params=pltpu.CompilerParams(
                dimension_semantics=("parallel", "arbitrary"),
                vmem_limit_bytes=vmem_limit,
            ),
            cost_estimate=cost,
        )(x2, w, b)

    # Lane-aligned prefix slices (cheap) -- padded columns/rows never escape.
    scores = out[:, :nc]
    bbox_deltas = out[:, nc_pad:nc_pad + nb]
    return scores, bbox_deltas


def init_params(key, in_channels, num_classes):
    """Deterministic synthetic init matching torch.nn.Linear shapes (stored transposed)."""
    k1, k2, k3, k4 = jax.random.split(key, 4)
    bound = 1.0 / math.sqrt(in_channels)
    w_cls = jax.random.uniform(k1, (in_channels, num_classes), jnp.float32, -bound, bound)
    b_cls = jax.random.uniform(k2, (num_classes,), jnp.float32, -bound, bound)
    w_bbox = jax.random.uniform(k3, (in_channels, num_classes * 4), jnp.float32, -bound, bound)
    b_bbox = jax.random.uniform(k4, (num_classes * 4,), jnp.float32, -bound, bound)
    return w_cls, b_cls, w_bbox, b_bbox


if __name__ == "__main__":
    key = jax.random.PRNGKey(0)
    kx1, kp1, kx2, kp2 = jax.random.split(key, 4)

    # --- Case 1: 4-D input with trailing [1,1] spatial dims (simple resident-W path).
    batch, in_channels, num_classes = 16, 64, 8
    x = jax.random.normal(kx1, (batch, in_channels, 1, 1), jnp.float32)
    w_cls, b_cls, w_bbox, b_bbox = init_params(kp1, in_channels, num_classes)
    scores, bbox_deltas = fast_rcnn_predictor(x, w_cls, b_cls, w_bbox, b_bbox)
    jax.block_until_ready((scores, bbox_deltas))

    x_flat = x.reshape(batch, -1)
    assert scores.shape == (batch, num_classes)
    assert bbox_deltas.shape == (batch, num_classes * 4)
    assert jnp.allclose(scores, x_flat @ w_cls + b_cls, atol=2e-2, rtol=2e-2)
    assert jnp.allclose(bbox_deltas, x_flat @ w_bbox + b_bbox, atol=2e-2, rtol=2e-2)

    # --- Case 2: ragged N and ragged C, forcing the C-tiled accumulator fallback.
    batch2, in_channels2, num_classes2 = 10, 200, 3
    x2d = jax.random.normal(kx2, (batch2, in_channels2), jnp.float32)
    w_cls2, b_cls2, w_bbox2, b_bbox2 = init_params(kp2, in_channels2, num_classes2)
    scores2, bbox2 = fast_rcnn_predictor(x2d, w_cls2, b_cls2, w_bbox2, b_bbox2, block_c=128)
    jax.block_until_ready((scores2, bbox2))

    assert scores2.shape == (batch2, num_classes2)
    assert bbox2.shape == (batch2, num_classes2 * 4)
    assert jnp.allclose(scores2, x2d @ w_cls2 + b_cls2, atol=2e-2, rtol=2e-2)
    assert jnp.allclose(bbox2, x2d @ w_bbox2 + b_bbox2, atol=2e-2, rtol=2e-2)

    print("KERNEL_OK")
</pallas_src>

<mosaic_0001>
module attributes {stable_mosaic.version = 11 : i64} {
  func.func @_fused_head_kernel(%arg0: i32, %arg1: memref<8x64xf32, #tpu.memory_space<vmem>>, %arg2: memref<64x256xbf16, #tpu.memory_space<vmem>>, %arg3: memref<1x256xf32, #tpu.memory_space<vmem>>, %arg4: memref<8x256xf32, #tpu.memory_space<vmem>>) attributes {dimension_semantics = [#tpu.dimension_semantics<parallel>], iteration_bounds = array<i64: 2>, scalar_prefetch = 0 : i64, scratch_operands = 0 : i64, tpu.core_type = #tpu.core_type<tc>, window_params = [{transform_indices = @transform_0, window_bounds = array<i64: 8, 64>}, {pipeline_mode = #tpu.pipeline_mode<synchronous>, transform_indices = @transform_1, window_bounds = array<i64: 64, 256>}, {pipeline_mode = #tpu.pipeline_mode<synchronous>, transform_indices = @transform_2, window_bounds = array<i64: 1, 256>}, {transform_indices = @transform_3, window_bounds = array<i64: 8, 256>}]} {
    %c0 = arith.constant 0 : index
    %c0_0 = arith.constant 0 : index
    %0 = vector.load %arg1[%c0, %c0_0] : memref<8x64xf32, #tpu.memory_space<vmem>>, vector<8x64xf32>
    %1 = arith.truncf %0 : vector<8x64xf32> to vector<8x64xbf16>
    %c0_1 = arith.constant 0 : index
    %c0_2 = arith.constant 0 : index
    %2 = vector.load %arg2[%c0_1, %c0_2] : memref<64x256xbf16, #tpu.memory_space<vmem>>, vector<64x256xbf16>
    %cst = arith.constant dense<0.000000e+00> : vector<8x256xf32>
    %3 = tpu.matmul %1, %2, %cst {dimension_numbers = #tpu.dot_dimension_numbers<[1], [0], [0], [1], [0, 0, 1, 1], [], []>} : vector<8x64xbf16>, vector<64x256xbf16>, vector<8x256xf32> -> vector<8x256xf32>
    %c0_3 = arith.constant 0 : index
    %c0_4 = arith.constant 0 : index
    %4 = vector.load %arg3[%c0_3, %c0_4] : memref<1x256xf32, #tpu.memory_space<vmem>>, vector<1x256xf32>
    %5 = vector.broadcast %4 : vector<1x256xf32> to vector<8x256xf32>
    %6 = arith.addf %3, %5 : vector<8x256xf32>
    %c0_5 = arith.constant 0 : index
    %c0_6 = arith.constant 0 : index
    %7 = vector.load %arg4[%c0_5, %c0_6] : memref<8x256xf32, #tpu.memory_space<vmem>>, vector<8x256xf32>
    tpu.vector_store %arg4[%c0_5, %c0_6], %6 {strides = array<i32>} : memref<8x256xf32, #tpu.memory_space<vmem>>, vector<8x256xf32>,
    return
  }
  func.func @transform_0(%arg0: i32) -> (i32, i32) {
    %c0_i32 = arith.constant 0 : i32
    %c0_i32_0 = arith.constant 0 : i32
    return %arg0, %c0_i32 : i32, i32
  }
  func.func @transform_1(%arg0: i32) -> (i32, i32) {
    %c0_i32 = arith.constant 0 : i32
    %c0_i32_0 = arith.constant 0 : i32
    %c0_i32_1 = arith.constant 0 : i32
    return %c0_i32, %c0_i32_0 : i32, i32
  }
  func.func @transform_2(%arg0: i32) -> (i32, i32) {
    %c0_i32 = arith.constant 0 : i32
    %c0_i32_0 = arith.constant 0 : i32
    %c0_i32_1 = arith.constant 0 : i32
    return %c0_i32, %c0_i32_0 : i32, i32
  }
  func.func @transform_3(%arg0: i32) -> (i32, i32) {
    %c0_i32 = arith.constant 0 : i32
    %c0_i32_0 = arith.constant 0 : i32
    return %arg0, %c0_i32 : i32, i32
  }
}

</mosaic_0001>

<bundles_post_ra>
// kernel: fast_rcnn_predictor.1
= control target key start
LH: loop header
LB: loop body
LE: loop exit
PB: predicated region body
PF: predicated region fallthrough
CT: control target
= control target key end

     0   :  { %s403_s12 = smov 0   ;;  %s447_s0 = inlined_call_operand.vmem [shape: f32[16,64], index: 0, kind: input, shape index: {}]   ;;  %s448_s1 = inlined_call_operand.vmem [shape: bf16[64,256], index: 1, kind: input, shape index: {}]   ;;  %s449_s2 = inlined_call_operand.vmem [shape: f32[1,256], index: 2, kind: input, shape index: {}]   ;;  %s450_s3 = inlined_call_operand.vmem [shape: f32[16,256], index: 3, kind: output, shape index: {}]  }
   0x1 LB: > { %s333_s13 = sadd.s32 4294967295, %s380_s12   ;;  %p337_p0 = scmp.ge.s32.totalorder %s380_s12, 1  ;;  %s380_s12 = sphi %s403_s12, %s13_s12  }
   0x2   : > { %p136_p1 = scmp.lt.s32.totalorder %s380_s12, 3 }
   0x4   : > { %p137_p2 = pnand %p337_p0, %p136_p1 }
   0x5   : > { %v362_v0 = vld [vmem:[%s448_s1 + $0x4] ss:$8 sps:$4 sm:$0xff] (!%p137_p2)   ;;  %p159_p3 = scmp.lt.s32.totalorder (!%p137_p2), %s333_s13, 1  ;;  %v364_v1 = vld [vmem:[%s448_s1] ss:$8 sps:$4 sm:$0xff] (!%p137_p2)   ;;  %v382_v2 = vmov (!%p137_p2), 0   ;;  %v181_v11 = vlaneseq (!%p137_p2) }
   0x6   : > { %140 = sbr.rel (%p137_p2) target bundleno = 238 (0xee), region = 32  ;;  %267 = vmatprep.mubr.bf16.mxu0 (!%p137_p2), %v382_v2  ;;  %235 = vmatprep.subr.bf16.mxu0 (!%p137_p2), %v362_v0  ;;  %v365_v3 = vld [vmem:[%s448_s1 + $0x14] ss:$8 sps:$4 sm:$0xff] (!%p137_p2)   ;;  %v367_v4 = vld [vmem:[%s448_s1 + $0x10] ss:$8 sps:$4 sm:$0xff] (!%p137_p2)   ;;  %vm231_vm0 = vcmask (!%p137_p2), 523264  }
   0x7   : > { %236 = vmatpush1.bf16.msra.mxu0 (!%p137_p2), %v364_v1  ;;  %v368_v5 = vld [vmem:[%s448_s1 + $0x24] ss:$8 sps:$4 sm:$0xff] (!%p137_p2)   ;;  %v370_v6 = vld [vmem:[%s448_s1 + $0x20] ss:$8 sps:$4 sm:$0xff] (!%p137_p2)   ;;  %v371_v7 = vld [vmem:[%s448_s1 + $0x34] ss:$8 sps:$4 sm:$0xff] (!%p137_p2)  }
   0x8   : > { %237 = vmatprep.subr.bf16.mxu0 (!%p137_p2), %v365_v3  ;;  %v373_v8 = vld [vmem:[%s448_s1 + $0x30] ss:$8 sps:$4 sm:$0xff] (!%p137_p2)   ;;  %v182_v12 = vshrl.u32 (!%p137_p2), %v181_v11, 7  ;;  %v179_v14 = vld [vmem:[%s449_s2] sm:$0x3] (!%p137_p2) }
   0xa   : > { %v183_v13 = vsub.s32 (!%p137_p2), 0, %v182_v12  ;;  %v187_v15 = vsub.s32 (!%p137_p2), 1, %v182_v12 }
   0xb   : > { %238 = vmatpush1.bf16.msra.mxu0 (!%p137_p2), %v367_v4 }
   0xc   : > { %239 = vmatprep.subr.bf16.mxu0 (!%p137_p2), %v368_v5  ;;  %v184_v16 = vrot.slane (!%p137_p2), %v179_v14, %v183_v13  ;;  %v188_v17 = vrot.slane (!%p137_p2), %v179_v14, %v187_v15 }
   0xd   : > { %s452_s13 = smov (!%p159_p3, %s333_s13), 1 }
   0xe   : > { %s338_s24 = sshll.u32 %s452_s13, 3  ;;  %s352_s9 = sshll.u32 %s452_s13, 4 }
   0xf   : > { %s162_s4 = scalar_lea.vmem %s447_s0, %s338_s24  ;;  %240 = vmatpush1.bf16.msra.mxu0 %v370_v6  ;;  %s167_s14 = scalar_lea.vmem %s450_s3, %s352_s9 }
  0x10   : > { %v169_v9 = vld [vmem:[%s162_s4] sm:$0xff]  ;;  %241 = vmatprep.subr.bf16.mxu0 %v371_v7 }
  0x11   : > { %v170_v10 = vpack.c.bf16 %v169_v9, %v169_v9 }
  0x13   : > { %242 = vmatpush1.bf16.msra.mxu0 %v373_v8 }
  0x16   : > { %349 = vmatmul.mubr.msk.bf16.vlgmr.msra.gmra.mrb[0].mxu0 %vm231_vm0, %v170_v10 }
  0xe9   : > { %v269_v18 = vpop.f32.mrb[0].mxu0 }
  0xea   : > { %v270_v19 = vadd.f32 %v269_v18, %v184_v16  ;;  %v271_v20 = vpop.f32.mrb[1].mxu0 }
  0xeb   : > { %v272_v21 = vadd.f32 %v271_v20, %v188_v17  ;;  %v273_v22 = vpop.f32.mrb[2].mxu0 }
  0xec   : > { %276 = vst [vmem:[%s167_s14] sm:$0xff] %v270_v19  ;;  %v274_v23 = vpop.f32.mrb[3].mxu0 }
  0xed   : > { %277 = vst [vmem:[%s167_s14 + $0x8] sm:$0xff] %v272_v21 }
  0xee PF: > { %s13_s12 = sadd.s32 1, %s380_s12  }
  0xef   : > { %p10_p4 = scmp.ge.s32.totalorder %s13_s12, 4  }
  0xf1   :  { %12 = sbr.rel (!%p10_p4) target bundleno = 1 (0x1), region = 62 }

</bundles_post_ra>
